<compile_context>
chip_gen: v7x
topology: tpu7x:2x2x1
jax: 0.10.0
libtpu: 0.0.40
codegen_flags: <defaults>
</compile_context>

<pallas_src>
import numpy as np
import jax
import jax.numpy as jnp
from jax.experimental import pallas as pl
from jax.experimental.pallas import tpu as pltpu

# ---- Ndp hyperparameters (match the torch module's __init__ defaults) ----
N_RBF = 5                                # number of radial basis functions
T_PARAM = 10
L_PARAM = 10
TAU = 1.0
K_DOF = 1                                # len(state_index), state_index = arange(1)
A_Z = 25.0                               # DMPParameters default a_z
A_X = 1.0                                # DMPParameters a_x
DT = 1.0 / (T_PARAM * L_PARAM)           # 0.01
T_STEPS = int(np.round(TAU / DT)) + 1    # 101
OUTPUT_SIZE = N_RBF * K_DOF + 2 * K_DOF  # 7
OUT_USED = K_DOF + N_RBF * K_DOF         # 6 (goal + RBF weights; row 6 unused in fwd)

# The torch module takes an abstract `DNN`; here it is a deterministic 2-layer MLP.
D_IN = 16
D_HID = 32

# ---- lane-dense layout constants ----
T_PAD = 128                              # time steps padded to one lane tile
assert T_STEPS <= T_PAD

# Packed parameter/constant table layout (rows, all blocks 8-row aligned):
_W1_ROW = 0                              # rows  0:17 -> [W1 | b1]^T          (17, 32)
_W2_ROW = 24                             # rows 24:57 -> [W2[:6] | b2[:6]]^T  (33, 6)
_C_ROW = 64                              # rows 64:72 -> DMP closed-form table (8, 128)
TBL_ROWS = 72


# ------------------- host-side DMP constant table (float64) -------------------
# Euler recurrence per step (c1 = dt/tau, b_z = a_z/4):
#   y_{i+1} = y_i + c1*z_i
#   z_{i+1} = -c1*a_z*b_z*y_i + (1-c1*a_z)*z_i + c1*(a_z*b_z*goal + fx_i)
# with fx_i = (w @ psi_i) * x_{i+1} / sum(psi_i) * (goal - y0).
# Constant-coefficient linear recurrence -> solved exactly with matrix powers; the
# data-independent part collapses into a small (N_RBF+3, T_PAD) table (time on lanes).
def _build_dmp_table():
    c = np.exp(-A_X * np.linspace(0.0, 1.0, N_RBF))
    h = np.ones(N_RBF) * N_RBF ** 1.5 / c / A_X
    c1 = DT / TAU
    b_z = A_Z / 4.0
    n_steps = T_STEPS - 1                                    # 100

    # Phase and normalized RBF activations per step (data independent).
    x = (1.0 - A_X * DT / TAU) ** np.arange(1, n_steps + 1)  # x_{i+1}
    psi = np.exp(-h[None, :] * (x[:, None] - c[None, :]) ** 2)
    P = psi * x[:, None] / psi.sum(axis=1, keepdims=True)    # (n_steps, N)

    # First row of M^n:  A_n = (M^n)_00,  Bq_n = (M^n)_01.
    m00, m01 = 1.0, c1
    m10, m11 = -c1 * A_Z * b_z, 1.0 - c1 * A_Z
    A = np.zeros(T_STEPS)
    Bq = np.zeros(T_STEPS)
    A[0], Bq[0] = 1.0, 0.0
    for n in range(1, T_STEPS):
        A[n] = A[n - 1] * m00 + Bq[n - 1] * m10
        Bq[n] = A[n - 1] * m01 + Bq[n - 1] * m11

    # L[n, j] = Bq[n-1-j] for j <= n-1 (lower-triangular Toeplitz).
    L = np.zeros((T_STEPS, n_steps))
    for n in range(1, T_STEPS):
        L[n, :n] = Bq[n - 1::-1][:n]

    LP = c1 * (L @ P)                                        # (T_STEPS, N_RBF)
    gsum = c1 * A_Z * b_z * L.sum(axis=1)                    # (T_STEPS,)
    z0 = 0.01 * TAU                                          # dy0 * tau (dy0 = 0.01)

    tbl = np.zeros((N_RBF + 3, T_PAD))
    tbl[0:N_RBF, :T_STEPS] = LP.T
    tbl[N_RBF, :T_STEPS] = gsum
    tbl[N_RBF + 1, :T_STEPS] = A
    tbl[N_RBF + 2, :T_STEPS] = Bq * z0
    return tbl.astype(np.float32)


def pack_table(w1, b1, w2, b2):
    """Pack the MLP parameters (biases folded, unused output row dropped) and the
    DMP closed-form table into one (TBL_ROWS, T_PAD) f32 array -> a single DMA."""
    tbl = np.zeros((TBL_ROWS, T_PAD), np.float32)
    tbl[_W1_ROW:_W1_ROW + D_IN, 0:D_HID] = np.asarray(w1, np.float32).T
    tbl[_W1_ROW + D_IN, 0:D_HID] = np.asarray(b1, np.float32)
    tbl[_W2_ROW:_W2_ROW + D_HID, 0:OUT_USED] = np.asarray(w2, np.float32)[:OUT_USED].T
    tbl[_W2_ROW + D_HID, 0:OUT_USED] = np.asarray(b2, np.float32)[:OUT_USED]
    tbl[_C_ROW:_C_ROW + N_RBF + 3, :] = _build_dmp_table()
    return jnp.asarray(tbl)


# ------------------------- fused Pallas kernel -------------------------

def _ndp_fused_kernel(data_ref, tbl_ref, y_ref):
    """Fused MLP forward + closed-form DMP rollout, time on the lane axis.

    data: (R_pad, D_IN+2)   rows = rollouts (padded to 8); cols = [x | 1 | y0]
    tbl:  (TBL_ROWS, T_PAD) packed [ [W1|b1]^T ; [W2|b2]^T ; DMP table ]
    y:    (R_pad, T_PAD)    trajectories, one lane per time step
    """
    x_aug = data_ref[:, 0:D_IN + 1]                       # (R, 17) = [x | 1]
    y0 = data_ref[:, D_IN + 1:D_IN + 2]                   # (R, 1)

    # Layer 1 (bias folded):  h = tanh([x | 1] @ [W1 | b1]^T)
    w1t = tbl_ref[_W1_ROW:_W1_ROW + D_IN + 1, 0:D_HID]    # (17, 32)
    h = jnp.tanh(jnp.dot(x_aug, w1t, preferred_element_type=jnp.float32))  # (R, 32)

    # Layer 2 (only the 6 used outputs): out = h @ W2[:6]^T + b2[:6]
    w2t = tbl_ref[_W2_ROW:_W2_ROW + D_HID, 0:OUT_USED]                     # (32, 6)
    b2r = tbl_ref[_W2_ROW + D_HID:_W2_ROW + D_HID + 1, 0:OUT_USED]         # (1, 6)
    out = jnp.dot(h, w2t, preferred_element_type=jnp.float32) + b2r        # (R, 6)

    goal = out[:, 0:K_DOF]                                # (R, 1)
    w = out[:, K_DOF:K_DOF + N_RBF]                       # (R, 5)

    lp_t = tbl_ref[_C_ROW:_C_ROW + N_RBF, :]                               # (5, T_PAD)
    gsum = tbl_ref[_C_ROW + N_RBF:_C_ROW + N_RBF + 1, :]                   # (1, T_PAD)
    acol = tbl_ref[_C_ROW + N_RBF + 1:_C_ROW + N_RBF + 2, :]               # (1, T_PAD)
    z0r = tbl_ref[_C_ROW + N_RBF + 2:_C_ROW + N_RBF + 3, :]                # (1, T_PAD)

    # Closed-form rollout:  Y = (W*(goal-y0)) @ LP^T + goal*gsum + y0*A + Bq*z0
    force = jnp.dot(w * (goal - y0), lp_t, preferred_element_type=jnp.float32)
    y_ref[...] = (force + goal * gsum + y0 * acol + z0r).astype(y_ref.dtype)


_VMEM_SPEC = pl.BlockSpec(memory_space=pltpu.MemorySpace.VMEM)


@jax.jit
def ndp_forward(x, y0, table):
    """Equivalent of Ndp.forward(input, y0) -> (B, T_steps, k) trajectory."""
    B = x.shape[0]
    R = B * K_DOF
    rows = ((R + 7) // 8) * 8                      # sublane-pad rollouts

    # TODO(synk): goal/RBF-weight slicing assumes the module default K_DOF == 1;
    # k > 1 needs the interleaved (R, N) reshape of the MLP output as well.
    y0_col = y0.reshape(-1)[:R].reshape(R, 1).astype(jnp.float32)  # torch y0.reshape(-1,1)[:,0]
    ones = jnp.ones((R, 1), jnp.float32)
    data = jnp.concatenate([x.astype(jnp.float32), ones, y0_col], axis=1)  # (R, D_IN+2)
    data = jnp.pad(data, ((0, rows - R), (0, 0)))

    y_full = pl.pallas_call(
        _ndp_fused_kernel,
        out_shape=jax.ShapeDtypeStruct((rows, T_PAD), jnp.float32),
        in_specs=[_VMEM_SPEC, _VMEM_SPEC],
        out_specs=_VMEM_SPEC,
    )(data, table)

    y = y_full[:R, :T_STEPS]                       # (R, T): rollout-major
    # torch: y.view(B, k, T).transpose(2, 1) -> (B, T, k)
    return y.reshape(B, K_DOF, T_STEPS).transpose(0, 2, 1)


# --------------- reference (pure numpy, sequential Euler integration) ---------------

def _reference_forward(x, y0, w1, b1, w2, b2):
    k, N = K_DOF, N_RBF
    B = x.shape[0]
    R = B * k
    c = np.exp(-A_X * np.linspace(0.0, 1.0, N)).astype(np.float32)
    h = (np.ones(N) * N ** 1.5 / c / A_X).astype(np.float32)
    hid = np.tanh(x @ w1.T + b1)
    out = hid @ w2.T + b2
    goal = out[:, :k].reshape(R)
    w = out[:, k:k * (N + 1)].reshape(R, N)
    y0f = y0.reshape(-1)[:R].astype(np.float32)
    dy0 = np.zeros_like(y0f) + 0.01
    b_z = A_Z / 4.0
    y = y0f.copy()
    z = dy0 * TAU
    xph = 1.0
    Y = np.zeros((R, T_STEPS), dtype=np.float32)
    Y[:, 0] = y0f
    for i in range(T_STEPS - 1):
        dx = (-A_X * xph) / TAU
        xph = xph + dx * DT
        psi = np.exp(-h * (xph - c) ** 2)
        fx = (w @ psi) * xph * (goal - y0f) / psi.sum()
        dz = A_Z * (b_z * (goal - y) - z) + fx
        dy = z
        dz = dz / TAU
        dy = dy / TAU
        y = y + dy * DT
        z = z + dz * DT
        Y[:, i + 1] = y
    return Y.reshape(B, k, T_STEPS).transpose(0, 2, 1)


# ------------------------- main -------------------------

if __name__ == "__main__":
    key = jax.random.PRNGKey(0)
    k_x, k_y0, k_w1, k_b1, k_w2, k_b2 = jax.random.split(key, 6)

    B = 2
    x = jax.random.normal(k_x, (B, D_IN), dtype=jnp.float32)
    y0 = jax.random.normal(k_y0, (B, K_DOF), dtype=jnp.float32)

    # Deterministic 2-layer MLP parameters (natural torch shapes).
    w1 = (jax.random.normal(k_w1, (D_HID, D_IN), dtype=jnp.float32)
          / np.sqrt(D_IN)).astype(jnp.float32)
    b1 = (0.1 * jax.random.normal(k_b1, (D_HID,), dtype=jnp.float32)).astype(jnp.float32)
    w2 = (jax.random.normal(k_w2, (OUTPUT_SIZE, D_HID), dtype=jnp.float32)
          / np.sqrt(D_HID)).astype(jnp.float32)
    b2 = (0.1 * jax.random.normal(k_b2, (OUTPUT_SIZE,), dtype=jnp.float32)).astype(jnp.float32)

    # Pack parameters + host-precomputed (float64) DMP integration table once.
    # TODO(synk): param_grad (DMPparam.grad_tensor) feeds only the DMP backward
    # pass, not Ndp.forward, so it is not materialized here.
    table = pack_table(np.asarray(w1), np.asarray(b1), np.asarray(w2), np.asarray(b2))

    y_traj = jax.block_until_ready(ndp_forward(x, y0, table))
    assert y_traj.shape == (B, T_STEPS, K_DOF), y_traj.shape

    y_ref = _reference_forward(np.asarray(x), np.asarray(y0), np.asarray(w1),
                               np.asarray(b1), np.asarray(w2), np.asarray(b2))
    np.testing.assert_allclose(np.asarray(y_traj), y_ref, rtol=1e-3, atol=1e-3)

    print("KERNEL_OK")
</pallas_src>

<mosaic_0001>
module attributes {stable_mosaic.version = 11 : i64} {
  func.func @_ndp_fused_kernel(%arg0: memref<8x18xf32, #tpu.memory_space<vmem>>, %arg1: memref<72x128xf32, #tpu.memory_space<vmem>>, %arg2: memref<8x128xf32, #tpu.memory_space<vmem>>) attributes {dimension_semantics = [], scalar_prefetch = 0 : i64, scratch_operands = 0 : i64, tpu.core_type = #tpu.core_type<tc>} {
    %c0 = arith.constant 0 : index
    %c0_0 = arith.constant 0 : index
    %0 = vector.load %arg0[%c0, %c0_0] : memref<8x18xf32, #tpu.memory_space<vmem>>, vector<8x17xf32>
    %c0_1 = arith.constant 0 : index
    %c17 = arith.constant 17 : index
    %1 = vector.load %arg0[%c0_1, %c17] : memref<8x18xf32, #tpu.memory_space<vmem>>, vector<8x1xf32>
    %c0_2 = arith.constant 0 : index
    %c0_3 = arith.constant 0 : index
    %2 = vector.load %arg1[%c0_2, %c0_3] : memref<72x128xf32, #tpu.memory_space<vmem>>, vector<17x32xf32>
    %cst = arith.constant dense<0.000000e+00> : vector<8x32xf32>
    %3 = tpu.matmul %0, %2, %cst {dimension_numbers = #tpu.dot_dimension_numbers<[1], [0], [0], [1], [0, 0, 1, 1], [], []>} : vector<8x17xf32>, vector<17x32xf32>, vector<8x32xf32> -> vector<8x32xf32>
    %4 = math.tanh %3 : vector<8x32xf32>
    %c24 = arith.constant 24 : index
    %c0_4 = arith.constant 0 : index
    %5 = vector.load %arg1[%c24, %c0_4] : memref<72x128xf32, #tpu.memory_space<vmem>>, vector<32x6xf32>
    %c56 = arith.constant 56 : index
    %c0_5 = arith.constant 0 : index
    %6 = vector.load %arg1[%c56, %c0_5] : memref<72x128xf32, #tpu.memory_space<vmem>>, vector<1x6xf32>
    %cst_6 = arith.constant dense<0.000000e+00> : vector<8x6xf32>
    %7 = tpu.matmul %4, %5, %cst_6 {dimension_numbers = #tpu.dot_dimension_numbers<[1], [0], [0], [1], [0, 0, 1, 1], [], []>} : vector<8x32xf32>, vector<32x6xf32>, vector<8x6xf32> -> vector<8x6xf32>
    %8 = vector.broadcast %6 : vector<1x6xf32> to vector<8x6xf32>
    %9 = arith.addf %7, %8 : vector<8x6xf32>
    %10 = vector.extract_strided_slice %9 {offsets = [0, 0], sizes = [8, 1], strides = [1, 1]} : vector<8x6xf32> to vector<8x1xf32>
    %11 = vector.extract_strided_slice %9 {offsets = [0, 1], sizes = [8, 5], strides = [1, 1]} : vector<8x6xf32> to vector<8x5xf32>
    %c64 = arith.constant 64 : index
    %c0_7 = arith.constant 0 : index
    %12 = vector.load %arg1[%c64, %c0_7] : memref<72x128xf32, #tpu.memory_space<vmem>>, vector<5x128xf32>
    %c69 = arith.constant 69 : index
    %c0_8 = arith.constant 0 : index
    %13 = vector.load %arg1[%c69, %c0_8] : memref<72x128xf32, #tpu.memory_space<vmem>>, vector<1x128xf32>
    %c70 = arith.constant 70 : index
    %c0_9 = arith.constant 0 : index
    %14 = vector.load %arg1[%c70, %c0_9] : memref<72x128xf32, #tpu.memory_space<vmem>>, vector<1x128xf32>
    %c71 = arith.constant 71 : index
    %c0_10 = arith.constant 0 : index
    %15 = vector.load %arg1[%c71, %c0_10] : memref<72x128xf32, #tpu.memory_space<vmem>>, vector<1x128xf32>
    %16 = arith.subf %10, %1 : vector<8x1xf32>
    %17 = vector.broadcast %16 : vector<8x1xf32> to vector<8x5xf32>
    %18 = arith.mulf %11, %17 : vector<8x5xf32>
    %cst_11 = arith.constant dense<0.000000e+00> : vector<8x128xf32>
    %19 = tpu.matmul %18, %12, %cst_11 {dimension_numbers = #tpu.dot_dimension_numbers<[1], [0], [0], [1], [0, 0, 1, 1], [], []>} : vector<8x5xf32>, vector<5x128xf32>, vector<8x128xf32> -> vector<8x128xf32>
    %20 = vector.broadcast %10 : vector<8x1xf32> to vector<8x128xf32>
    %21 = vector.broadcast %13 : vector<1x128xf32> to vector<8x128xf32>
    %22 = arith.mulf %20, %21 : vector<8x128xf32>
    %23 = arith.addf %19, %22 : vector<8x128xf32>
    %24 = vector.broadcast %1 : vector<8x1xf32> to vector<8x128xf32>
    %25 = vector.broadcast %14 : vector<1x128xf32> to vector<8x128xf32>
    %26 = arith.mulf %24, %25 : vector<8x128xf32>
    %27 = arith.addf %23, %26 : vector<8x128xf32>
    %28 = vector.broadcast %15 : vector<1x128xf32> to vector<8x128xf32>
    %29 = arith.addf %27, %28 : vector<8x128xf32>
    %c0_12 = arith.constant 0 : index
    %c0_13 = arith.constant 0 : index
    %30 = vector.load %arg2[%c0_12, %c0_13] : memref<8x128xf32, #tpu.memory_space<vmem>>, vector<8x128xf32>
    tpu.vector_store %arg2[%c0_12, %c0_13], %29 {strides = array<i32>} : memref<8x128xf32, #tpu.memory_space<vmem>>, vector<8x128xf32>,
    return
  }
}

</mosaic_0001>

<bundles_post_ra>
// kernel: ndp_forward.1
= control target key start
LH: loop header
LB: loop body
LE: loop exit
PB: predicated region body
PF: predicated region fallthrough
CT: control target
= control target key end

     0   :  { %7 = vsyncpa [#allocation3], 0  ;;  %s410_s9 = smov [#allocation2]   ;;  %s456_s0 = inlined_call_operand.vmem [shape: f32[8,18], index: 0, kind: input, shape index: {}]   ;;  %s457_s1 = inlined_call_operand.hbm [shape: f32[72,128], index: 1, kind: input, shape index: {}]   ;;  %s458_s2 = inlined_call_operand.vmem [shape: f32[8,128], index: 2, kind: output, shape index: {}]  }
   0x1   :  { %s15_s10 = sshll.u32 %s410_s9, 4  ;;  %s386_s13 = scalar_lea.hbm %s457_s1, 1152  ;;  %s16_s10 = int_to_ptr.vmem [resolvable:$true] %s15_s10 }
   0x2   :  { %p387_p0 = scmp.ne.s32.totalorder %s457_s1, %s386_s13  ;;  %p390_p1 = scmp.lt.u32.totalorder %s386_s13, %s457_s1 }
   0x4   :  { %p392_p2 = pnand %p390_p1, %p387_p0 }
   0x6   :  { %395 = shalt.err (!%p392_p2)
}
   0x7   :  { %s396_s18 = scalar_lea.vmem %s16_s10, 1152  ;;  %p401_p4 = scmp.lt.s32.totalorder %s16_s10, %s16_s10 }
   0x8   :  { %p397_p3 = scmp.ne.s32.totalorder %s16_s10, %s396_s18  ;;  %p402_p5 = scmp.lt.s32.totalorder %s396_s18, %s396_s18 }
   0xa   :  { %p403_p6 = por %p402_p5, %p401_p4 }
   0xc   :  { %p404_p7 = pnand %p403_p6, %p397_p3 }
   0xe   :  { %407 = shalt.err (!%p404_p7)
}
   0xf   :  { %s411_s19 = smov 128   ;;  %s412_s20 = smov 8  }
  0x10   :  { %21 = dma.hbm_to_vmem [thread:$0]  %s457_s1, 1152, %s16_s10, [#allocation3], %s411_s19, %s411_s19, %s412_s20  }
  0x11   :  { %408 = dma.done.wait [#allocation3], 1152  }
  0x12   :  { %409 = vsyncadd [#allocation3], 4294966144  ;;  %v413_v0 = vmov 0.0|0.0   ;;  %vm414_vm0 = vmmov 0   ;;  %v415_v1 = vmov 0.0   ;;  %v26_v2 = vld [vmem:[#allocation2] sm:$0xff] }
  0x13   :  { %361 = vmatprep.subr.bf16.mxu0 %v413_v0  ;;  %342 = vmatprep.mubr.msk.f32.mxu0 %vm414_vm0, %v415_v1  ;;  %v27_v3 = vld [vmem:[#allocation2 + $0x8] sm:$0xff]  ;;  %v28_v5 = vld [vmem:[#allocation2 + $0x10] sm:$0x1]  ;;  %vm33_vm1 = vcmask 1040384   ;;  %v25_v6 = vld [vmem:[%s456_s0] sm:$0xff]  ;;  %vm29_vm2 = vcmask 138240  }
  0x14   :  { %364 = vmatprep.subr.bf16.mxu1 %v413_v0  ;;  %353 = vmatprep.mubr.msk.f32.mxu1 %vm414_vm0, %v415_v1  ;;  %v362_v4 = vpack.c.bf16 %v27_v3, %v26_v2  ;;  %v108_v7 = vld [vmem:[#allocation2 + $0x18] sm:$0xff]  ;;  %v109_v8 = vld [vmem:[#allocation2 + $0x20] sm:$0xff]  ;;  %v110_v9 = vld [vmem:[#allocation2 + $0x28] sm:$0xff]  ;;  %s416_s24 = smov 111   ;;  %vm117_vm3 = vcmask 261120   ;;  %v417_v16 = vmov 0  }
  0x15   :  { %v365_v10 = vpack.c.bf16 %v109_v8, %v108_v7  ;;  %v111_v11 = vld [vmem:[#allocation2 + $0x30] sm:$0xff]  ;;  %195 = vrot.lane.b32.xlu0 %v25_v6, %s416_s24  ;;  %381 = vset.pattern.permute.xlu1 %v417_v16  ;;  %v318_v17 = vld [vmem:[#allocation2 + $0x38] ss:$0 sm:$0xff]  ;;  %v191_v23 = vld [vmem:[#allocation2 + $0x40] sm:$0x1f]  ;;  %vm221_vm4 = vcmask 1044480  }
  0x16   :  { %363 = vmatpush3.bf16.msra.mxu0 %v362_v4  ;;  %v368_v12 = vpack.c.bf16 %v111_v11, %v110_v9  ;;  %380 = vset.pattern.permute.xlu0 %v417_v16  ;;  %s418_s0 = smov 127   ;;  %v419_v26 = vmov 17   ;;  %vm218_vm5 = vcmask 39936   ;;  %v320_v29 = vld [vmem:[#allocation2 + $0x45] ss:$0 sm:$0xff] }
  0x17   :  { %340 = vmatprep.subr.mxu0 %v415_v1  ;;  %366 = vmatpush3.bf16.msra.mxu1 %v365_v10  ;;  %v323_v30 = vld [vmem:[#allocation2 + $0x46] ss:$0 sm:$0xff]  ;;  %v324_v37 = vld [vmem:[#allocation2 + $0x47] ss:$0 sm:$0xff] }
  0x18   :  { %367 = vmatprep.subr.bf16.mxu1 %v413_v0 }
  0x1a   :  { %341 = vmatpush3.msk.msra.mxu0 %vm33_vm1, %v28_v5 }
  0x1b   :  { %343 = vmatmul.mubr.msk.f32.vlgmr.msra.gmra.mrb[0].mxu0 %vm29_vm2, %v25_v6  ;;  %356 = vmatprep.subr.mxu0 %v415_v1 }
  0x1c   :  { %358 = vmatprep.mubr.msk.f32.mxu0 %vm414_vm0, %v415_v1  ;;  %369 = vmatpush3.bf16.msra.mxu1 %v368_v12 }
  0x1d   :  { %357 = vmatpush3.msk.msra.mxu0 %vm221_vm4, %v191_v23 }
  0x87   :  { %v196_v19 = vpop.permute.xlu0 %195 }
  0xee   :  { %v103_v13 = vpop.f32.mrb[0].mxu0 }
  0xef   :  { %384 = vtanh.f32 %v103_v13  ;;  %v344_v14 = vpop.f32.mrb[1].mxu0 }
  0xf9   :  { %v385_v15 = vpop.eup %384 }
  0xfa   :  { %354 = vmatmul.mubr.msk.f32.vlgmr.msra.gmra.mrb[0].mxu1 %vm117_vm3, %v385_v15 }
 0x1cd   :  { %v187_v18 = vpop.f32.mrb[0].mxu1 }
 0x1ce   :  { %v188_v20 = vadd.f32 %v318_v17, %v187_v18  ;;  %v355_v21 = vpop.f32.mrb[1].mxu1 }
 0x1d0   :  { %v198_v22 = vsub.f32 %v188_v20, %v196_v19 }
 0x1d2   :  { %201 = vperm.xlu0 %380, %v198_v22  }
 0x1d6   :  { %383 = vset.pattern.permute.xlu0 %v419_v26 }
 0x251   :  { %v202_v24 = vpop.permute.xlu0 %201 }
 0x252   :  { %v204_v25 = vmul.f32 %v202_v24, %v188_v20 }
 0x254   :  { %216 = vrot.lane.b32.xlu1 %v204_v25, %s418_s0 }
 0x258   :  { %207 = vperm.xlu1 %381, %v188_v20  }
 0x25c   :  { %382 = vset.pattern.permute.xlu1 %v419_v26 }
 0x25d   :  { %296 = vperm.xlu1 %382, %v25_v6  }
 0x2c6   :  { %v217_v27 = vpop.permute.xlu1 %216 }
 0x2c7   :  { %359 = vmatmul.mubr.msk.f32.vlgmr.msra.gmra.mrb[2].mxu0 %vm218_vm5, %v217_v27 }
 0x2d7   :  { %v208_v28 = vpop.permute.xlu1 %207 }
 0x2d8   :  { %v214_v32 = vmul.f32 %v320_v29, %v208_v28 }
 0x2dc   :  { %v297_v31 = vpop.permute.xlu1 %296 }
 0x2dd   :  { %v303_v33 = vmul.f32 %v323_v30, %v297_v31 }
 0x39a   :  { %v291_v34 = vpop.f32.mrb[2].mxu0 }
 0x39b   :  { %v292_v35 = vadd.f32 %v291_v34, %v214_v32  ;;  %v360_v36 = vpop.f32.mrb[3].mxu0 }
 0x39d   :  { %v304_v38 = vadd.f32 %v303_v33, %v292_v35 }
 0x39f   :  { %v309_v39 = vadd.f32 %v324_v37, %v304_v38 }
 0x3a1   :  { %310 = vst [vmem:[%s458_s2] sm:$0xff] %v309_v39 }
 0x3a2   :  { %315 = vsyncpa [#allocation3], 1 }

</bundles_post_ra>
